<compile_context>
chip_gen: v7x
topology: tpu7x:2x2x1
jax: 0.10.0
libtpu: 0.0.40
codegen_flags: <defaults>
</compile_context>

<pallas_src>
import functools

import jax
import jax.numpy as jnp
from jax.experimental import pallas as pl
from jax.experimental.pallas import tpu as pltpu

NUM_PARALLEL_LAYERS = 3


def _round_up(x: int, m: int) -> int:
    return ((x + m - 1) // m) * m


def hnn_kernel(x_ref, w_ref, b_ref, out_ref, *, num_parallel, num_clusters):
    """Fused monotonic-encoder forward for one batch tile.

    x_ref:   (F, TB)      features on sublanes, batch on lanes (lane-dense)
    w_ref:   (P*C, F)     positive PMLinear weights (exp applied in wrapper)
    b_ref:   (P*C, 1)     PMLinear biases
    out_ref: (C, TB)      utility scores, batch on lanes
    """
    # Single MXU push for all P*C linear maps of this tile.
    z = jnp.dot(w_ref[...], x_ref[...], preferred_element_type=jnp.float32)
    z = z + b_ref[...]                      # lane-broadcast of (P*C, 1) biases
    s = jax.nn.sigmoid(z)                   # (P*C, TB) f32, VPU + EUP
    # Mean over the P parallel layers; rows are grouped p-major (row = p*C + c).
    acc = s[0:num_clusters, :]
    for p in range(1, num_parallel):
        acc = acc + s[p * num_clusters:(p + 1) * num_clusters, :]
    out_ref[...] = acc * (1.0 / num_parallel)


def heuristic_nn_forward(x, w_raw, b, *, tile_b: int = 2048):
    """HeuristicNeuralNetwork forward.

    x:     (B, F)    input features
    w_raw: (P, C, F) raw PMLinear weights (one F-vector per (layer, cluster))
    b:     (P, C)    PMLinear biases
    returns (B, C) float32 utility scores.
    """
    B, F = x.shape
    P, C, F2 = w_raw.shape
    assert F2 == F and b.shape == (P, C)

    # Positivity + layer fusion hoisted out of the kernel (constant across tiles).
    w_pos = jnp.exp(w_raw).reshape(P * C, F).astype(jnp.float32)   # (P*C, F)
    bias = b.reshape(P * C, 1).astype(jnp.float32)                 # (P*C, 1)

    # Lane-dense layout: batch on the lane (last) axis.
    xt = x.astype(jnp.float32).T                                   # (F, B)
    Bp = _round_up(max(B, 1), 128)
    tb = _round_up(min(max(tile_b, 128), Bp), 128)
    Bp = _round_up(Bp, tb)
    if Bp != B:
        xt = jnp.pad(xt, ((0, 0), (0, Bp - B)))

    grid = (Bp // tb,)
    out_t = pl.pallas_call(
        functools.partial(hnn_kernel, num_parallel=P, num_clusters=C),
        out_shape=jax.ShapeDtypeStruct((C, Bp), jnp.float32),
        grid=grid,
        in_specs=[
            pl.BlockSpec((F, tb), lambda i: (0, i)),       # streamed batch tiles
            pl.BlockSpec((P * C, F), lambda i: (0, 0)),    # resident weights
            pl.BlockSpec((P * C, 1), lambda i: (0, 0)),    # resident biases
        ],
        out_specs=pl.BlockSpec((C, tb), lambda i: (0, i)),
        compiler_params=pltpu.CompilerParams(
            dimension_semantics=("parallel",),             # megacore-shard batch
        ),
    )(xt, w_pos, bias)

    return out_t[:, :B].T                                  # (B, C)


def reference_forward(x, w_raw, b):
    """Pure-JAX reference mirroring the PyTorch module's loop structure."""
    P, C, _ = w_raw.shape
    cols = []
    for c in range(C):
        acc = 0.0
        for p in range(P):
            acc = acc + jax.nn.sigmoid(x @ jnp.exp(w_raw[p, c]) + b[p, c])
        cols.append(acc / P)
    return jnp.stack(cols, axis=1)


if __name__ == "__main__":
    # Small shapes consistent with the module's forward:
    #   X: (batch_size, num_criteria) -> utility: (batch_size, num_clusters)
    batch_size = 8
    num_criteria = 16
    num_clusters = 4

    key = jax.random.PRNGKey(0)
    kx, kw, kb, kx2 = jax.random.split(key, 4)

    x = jax.random.normal(kx, (batch_size, num_criteria), dtype=jnp.float32)
    w_raw = 0.1 * jax.random.normal(
        kw, (NUM_PARALLEL_LAYERS, num_clusters, num_criteria), dtype=jnp.float32
    )
    b = 0.1 * jax.random.normal(
        kb, (NUM_PARALLEL_LAYERS, num_clusters), dtype=jnp.float32
    )

    out = jax.block_until_ready(heuristic_nn_forward(x, w_raw, b))
    ref = reference_forward(x, w_raw, b)
    assert out.shape == (batch_size, num_clusters)
    assert jnp.allclose(out, ref, atol=1e-5, rtol=1e-5), (out, ref)

    # Second check: ragged batch that exercises the multi-tile (pipelined) path.
    x2 = jax.random.normal(kx2, (300, num_criteria), dtype=jnp.float32)
    out2 = jax.block_until_ready(heuristic_nn_forward(x2, w_raw, b, tile_b=128))
    ref2 = reference_forward(x2, w_raw, b)
    assert out2.shape == (300, num_clusters)
    assert jnp.allclose(out2, ref2, atol=1e-5, rtol=1e-5), (out2, ref2)

    print("KERNEL_OK")
</pallas_src>

<mosaic_0001>
module attributes {stable_mosaic.version = 11 : i64} {
  func.func @hnn_kernel(%arg0: i32, %arg1: memref<16x128xf32, #tpu.memory_space<vmem>>, %arg2: memref<12x16xf32, #tpu.memory_space<vmem>>, %arg3: memref<12x1xf32, #tpu.memory_space<vmem>>, %arg4: memref<4x128xf32, #tpu.memory_space<vmem>>) attributes {dimension_semantics = [#tpu.dimension_semantics<parallel>], iteration_bounds = array<i64: 1>, scalar_prefetch = 0 : i64, scratch_operands = 0 : i64, tpu.core_type = #tpu.core_type<tc>, window_params = [{transform_indices = @transform_0, window_bounds = array<i64: 16, 128>}, {pipeline_mode = #tpu.pipeline_mode<synchronous>, transform_indices = @transform_1, window_bounds = array<i64: 12, 16>}, {pipeline_mode = #tpu.pipeline_mode<synchronous>, transform_indices = @transform_2, window_bounds = array<i64: 12, 1>}, {transform_indices = @transform_3, window_bounds = array<i64: 4, 128>}]} {
    %c0 = arith.constant 0 : index
    %c0_0 = arith.constant 0 : index
    %0 = vector.load %arg2[%c0, %c0_0] : memref<12x16xf32, #tpu.memory_space<vmem>>, vector<12x16xf32>
    %c0_1 = arith.constant 0 : index
    %c0_2 = arith.constant 0 : index
    %1 = vector.load %arg1[%c0_1, %c0_2] : memref<16x128xf32, #tpu.memory_space<vmem>>, vector<16x128xf32>
    %cst = arith.constant dense<0.000000e+00> : vector<12x128xf32>
    %2 = tpu.matmul %0, %1, %cst {dimension_numbers = #tpu.dot_dimension_numbers<[1], [0], [0], [1], [0, 0, 1, 1], [], []>} : vector<12x16xf32>, vector<16x128xf32>, vector<12x128xf32> -> vector<12x128xf32>
    %c0_3 = arith.constant 0 : index
    %c0_4 = arith.constant 0 : index
    %3 = vector.load %arg3[%c0_3, %c0_4] : memref<12x1xf32, #tpu.memory_space<vmem>>, vector<12x1xf32>
    %4 = vector.broadcast %3 : vector<12x1xf32> to vector<12x128xf32>
    %5 = arith.addf %2, %4 : vector<12x128xf32>
    %6 = arith.negf %5 : vector<12x128xf32>
    %7 = math.exp %6 : vector<12x128xf32>
    %cst_5 = arith.constant 1.000000e+00 : f32
    %8 = vector.broadcast %cst_5 : f32 to vector<12x128xf32>
    %9 = arith.addf %8, %7 : vector<12x128xf32>
    %10 = arith.divf %8, %9 : vector<12x128xf32>
    %11 = vector.extract_strided_slice %10 {offsets = [0, 0], sizes = [4, 128], strides = [1, 1]} : vector<12x128xf32> to vector<4x128xf32>
    %12 = vector.extract_strided_slice %10 {offsets = [4, 0], sizes = [4, 128], strides = [1, 1]} : vector<12x128xf32> to vector<4x128xf32>
    %13 = arith.addf %11, %12 : vector<4x128xf32>
    %14 = vector.extract_strided_slice %10 {offsets = [8, 0], sizes = [4, 128], strides = [1, 1]} : vector<12x128xf32> to vector<4x128xf32>
    %15 = arith.addf %13, %14 : vector<4x128xf32>
    %cst_6 = arith.constant 0.333333343 : f32
    %16 = vector.broadcast %cst_6 : f32 to vector<4x128xf32>
    %17 = arith.mulf %15, %16 : vector<4x128xf32>
    %c0_7 = arith.constant 0 : index
    %c0_8 = arith.constant 0 : index
    %18 = vector.load %arg4[%c0_7, %c0_8] : memref<4x128xf32, #tpu.memory_space<vmem>>, vector<4x128xf32>
    tpu.vector_store %arg4[%c0_7, %c0_8], %17 {strides = array<i32>} : memref<4x128xf32, #tpu.memory_space<vmem>>, vector<4x128xf32>,
    return
  }
  func.func @transform_0(%arg0: i32) -> (i32, i32) {
    %c0_i32 = arith.constant 0 : i32
    %c0_i32_0 = arith.constant 0 : i32
    return %c0_i32, %arg0 : i32, i32
  }
  func.func @transform_1(%arg0: i32) -> (i32, i32) {
    %c0_i32 = arith.constant 0 : i32
    %c0_i32_0 = arith.constant 0 : i32
    %c0_i32_1 = arith.constant 0 : i32
    return %c0_i32, %c0_i32_0 : i32, i32
  }
  func.func @transform_2(%arg0: i32) -> (i32, i32) {
    %c0_i32 = arith.constant 0 : i32
    %c0_i32_0 = arith.constant 0 : i32
    %c0_i32_1 = arith.constant 0 : i32
    return %c0_i32, %c0_i32_0 : i32, i32
  }
  func.func @transform_3(%arg0: i32) -> (i32, i32) {
    %c0_i32 = arith.constant 0 : i32
    %c0_i32_0 = arith.constant 0 : i32
    return %c0_i32, %arg0 : i32, i32
  }
}

</mosaic_0001>

<bundles_post_ra>
// kernel: tpu_custom_call.1
= control target key start
LH: loop header
LB: loop body
LE: loop exit
PB: predicated region body
PF: predicated region fallthrough
CT: control target
= control target key end

     0   :  { %8 = vsyncpa [#allocation3], 0  ;;  %s303_s0 = inlined_call_operand.vmem [shape: f32[16,128], index: 0, kind: input, shape index: {}]   ;;  %s304_s1 = inlined_call_operand.hbm [shape: f32[12,16], index: 1, kind: input, shape index: {}]   ;;  %s305_s2 = inlined_call_operand.vmem [shape: f32[12,1], index: 2, kind: input, shape index: {}]   ;;  %s306_s3 = inlined_call_operand.hbm [shape: f32[4,128], index: 3, kind: output, shape index: {}]  }
   0x1   :  { %9 = vsyncpa [#allocation4], 0  ;;  %s242_s12 = smov [#allocation2]   ;;  %s194_s16 = scalar_lea.hbm %s304_s1, 256 }
   0x2   :  { %s17_s13 = sshll.u32 %s242_s12, 4  ;;  %p195_p0 = scmp.ne.s32.totalorder %s304_s1, %s194_s16  ;;  %s18_s13 = int_to_ptr.vmem [resolvable:$true] %s17_s13 }
   0x3   :  { %p198_p1 = scmp.lt.u32.totalorder %s194_s16, %s304_s1 }
   0x5   :  { %p200_p2 = pnand %p198_p1, %p195_p0 }
   0x7   :  { %203 = shalt.err (!%p200_p2)
}
   0x8   :  { %s204_s21 = scalar_lea.vmem %s18_s13, 256  ;;  %p209_p4 = scmp.lt.s32.totalorder %s18_s13, %s18_s13 }
   0x9   :  { %p205_p3 = scmp.ne.s32.totalorder %s18_s13, %s204_s21  ;;  %p210_p5 = scmp.lt.s32.totalorder %s204_s21, %s204_s21 }
   0xb   :  { %p211_p6 = por %p210_p5, %p209_p4 }
   0xd   :  { %p212_p7 = pnand %p211_p6, %p205_p3 }
   0xf   :  { %215 = shalt.err (!%p212_p7)
}
  0x10   :  { %s243_s22 = smov 128   ;;  %s244_s23 = smov 8  }
  0x11   :  { %23 = dma.hbm_to_vmem [thread:$0]  %s304_s1, 256, %s18_s13, [#allocation3], %s243_s22, %s243_s22, %s244_s23  }
  0x12   :  { %238 = dma.done.wait [#allocation3], 256  }
  0x13   :  { %239 = vsyncadd [#allocation3], 4294967040  ;;  %v245_v0 = vmov 0   ;;  %vm45_vm0 = vcmask 130048   ;;  %v31_v1 = vld [vmem:[%s303_s0] sm:$0xff]  ;;  %v32_v2 = vld [vmem:[%s303_s0 + $0x8] sm:$0xff] }
  0x14   :  { %185 = vset.pattern.permute.xlu0 %v245_v0  ;;  %v29_v3 = vld [vmem:[#allocation2] sm:$0xff]  ;;  %v176_v4 = vpack.c.bf16 %v32_v2, %v31_v1  ;;  %v34_v6 = vld [vmem:[%s305_s2 + $0x8] sm:$0xf]  ;;  %s246_s0 = smov [#allocation5]  }
  0x15   :  { %173 = vmatprep.mubr.msk.f32.mxu0 %vm45_vm0, %v29_v3  ;;  %v33_v5 = vld [vmem:[%s305_s2] sm:$0xff]  ;;  %v30_v7 = vld [vmem:[#allocation2 + $0x8] sm:$0xf]  ;;  %s152_s2 = sshll.u32 %s246_s0, 4  ;;  %s153_s2 = int_to_ptr.vmem [resolvable:$true] %s152_s2 }
  0x16   :  { %37 = vperm.xlu0 %185, %v33_v5   ;;  %177 = vmatprep.subr.bf16.mxu0 %v176_v4  ;;  %s216_s6 = scalar_lea.vmem %s153_s2, 64  ;;  %p221_p9 = scmp.lt.s32.totalorder %s153_s2, %s153_s2 }
  0x17   :  { %179 = vmatpush3.bf16.msra.mxu0 %v176_v4  ;;  %p217_p8 = scmp.ne.s32.totalorder %s153_s2, %s216_s6  ;;  %p222_p10 = scmp.lt.s32.totalorder %s216_s6, %s216_s6 }
  0x19   :  { %p223_p11 = por %p222_p10, %p221_p9 }
  0x1a   :  { %42 = vperm.xlu0 %185, %v34_v6   ;;  %174 = vmatmul.mubr.msk.f32.vlgmr.msra.gmra.mrb[0].mxu0 %vm45_vm0, %v30_v7 }
  0x1b   :  { %p224_p12 = pnand %p223_p11, %p217_p8 }
  0x95   :  { %v38_v8 = vpop.permute.xlu0 %37 }
  0x99   :  { %v43_v9 = vpop.permute.xlu0 %42 }
  0xed   :  { %v175_v10 = vpop.f32.mrb[0].mxu0 }
  0xee   :  { %v124_v11 = vadd.f32 %v175_v10, %v43_v9  ;;  %v118_v12 = vpop.f32.mrb[1].mxu0 }
  0xef   :  { %v119_v13 = vadd.f32 %v118_v12, %v38_v8 }
  0xf0   :  { %v164_v14 = vmul.f32 -1.442695, %v124_v11 }
  0xf1   :  { %v163_v15 = vmul.f32 -1.442695, %v119_v13 }
  0xf2   :  { %186 = vpow2.f32 %v164_v14 }
  0xf3   :  { %188 = vpow2.f32 %v163_v15 }
  0xfc   :  { %v187_v16 = vpop.eup %186 }
  0xfd   :  { %v189_v17 = vpop.eup %188  ;;  %v134_v19 = vadd.f32 1.0, %v187_v16 }
  0xfe   :  { %v133_v18 = vadd.f32 1.0, %v189_v17 }
 0x100   :  { %190 = vrcp.f32 %v133_v18 }
 0x101   :  { %192 = vrcp.f32 %v134_v19 }
 0x10a   :  { %v191_v20 = vpop.eup %190 }
 0x10b   :  { %v140_v21 = vrot.slane %v191_v20, 4  ;;  %v193_v23 = vpop.eup %192 }
 0x10d   :  { %v142_v22 = vadd.f32 %v191_v20, %v140_v21 }
 0x10f   :  { %v143_v24 = vadd.f32 %v193_v23, %v142_v22 }
 0x111   :  { %v144_v25 = vmul.f32 0.33333334, %v143_v24 }
 0x113   :  { %145 = vst [vmem:[#allocation5] sm:$0xf] %v144_v25 }
 0x114   :  { %227 = shalt.err (!%p224_p12)
}
 0x115   :  { %s228_s9 = scalar_lea.hbm %s306_s3, 64 }
 0x116   :  { %p229_p13 = scmp.ne.s32.totalorder %s306_s3, %s228_s9  ;;  %p232_p0 = scmp.lt.u32.totalorder %s228_s9, %s306_s3 }
 0x118   :  { %p234_p1 = pnand %p232_p0, %p229_p13 }
 0x11a   :  { %237 = shalt.err (!%p234_p1)
}
 0x11b   :  { %155 = dma.vmem_to_hbm [thread:$0]  %s153_s2, 64, %s306_s3, [#allocation4]  }
 0x11c   :  { %240 = dma.done.wait [#allocation4], 64  }
 0x11d   :  { %241 = vsyncadd [#allocation4], 4294967232 }
 0x11e   :  { %159 = vsyncpa [#allocation3], 1 }
 0x11f   :  { %160 = vsyncpa [#allocation4], 1 }

</bundles_post_ra>
